<compile_context>
chip_gen: v6e
topology: v6e:2x2x1
jax: 0.10.0
libtpu: 0.0.40
codegen_flags: <defaults>
</compile_context>

<pallas_src>
import jax
import jax.numpy as jnp
from jax.experimental import pallas as pl
from jax.experimental.pallas import tpu as pltpu


# ----------------------------------------------------------------------------
# Kernel factory (mode-specialized: training / eval / no-BN drop unused refs)
# ----------------------------------------------------------------------------
def _make_switch_norm_kernel(*, eps, momentum, hw, training, using_bn,
                             using_moving_average):
    bessel = float(hw) / float(hw - 1) if hw > 1 else 1.0  # torch .var() is unbiased; HW==1 guarded
    inv_hw = 1.0 / float(hw)
    emit_running = using_bn and training

    def kernel(*refs):
        it = iter(refs)
        x_ref = next(it)
        gamma_ref = next(it)
        beta_ref = next(it)
        if using_bn:
            rmean_ref = next(it)
            rvar_ref = next(it)
        mw_ref = next(it)          # softmaxed mean switch weights (SMEM)
        vw_ref = next(it)          # softmaxed var switch weights (SMEM)
        y_ref = next(it)
        if emit_running:
            new_rmean_ref = next(it)
            new_rvar_ref = next(it)
        stat_a_ref = next(it)      # phase 0: per-(n,c) sum      -> phase 1: scale  (reused)
        stat_b_ref = next(it)      # phase 0: per-(n,c) sum(x^2) -> phase 1: shift  (reused)

        phase = pl.program_id(0)   # 0 = accumulate moments, 1 = normalize
        bi = pl.program_id(1)      # batch index
        gi = pl.program_id(2)      # spatial-tile index

        # -------- phase 0: accumulate per-(n, c) first/second moments -------------------
        @pl.when(phase == 0)
        def _accumulate():
            xb = x_ref[0].astype(jnp.float32)                    # (C, T), f32 math
            ps = jnp.sum(xb, axis=-1, keepdims=True)             # (C, 1)
            pss = jnp.sum(xb * xb, axis=-1, keepdims=True)       # (C, 1)

            @pl.when(gi == 0)
            def _init():
                stat_a_ref[bi] = ps
                stat_b_ref[bi] = pss

            @pl.when(gi > 0)
            def _acc():
                stat_a_ref[bi] = stat_a_ref[bi] + ps
                stat_b_ref[bi] = stat_b_ref[bi] + pss

        # -------- phase 1: finalize mixed stats once, then normalize every tile ----------
        @pl.when(phase == 1)
        def _normalize():
            @pl.when((bi == 0) & (gi == 0))
            def _finalize_stats():
                mean_in = stat_a_ref[...] * inv_hw               # (N, C, 1)
                msq = stat_b_ref[...] * inv_hw
                # one-pass variance, clamped against catastrophic cancellation, then the
                # unbiased (torch default) correction.
                var_in = jnp.maximum(msq - mean_in * mean_in, 0.0) * bessel
                temp = var_in + mean_in * mean_in
                mean_ln = jnp.mean(mean_in, axis=1, keepdims=True)            # (N, 1, 1)
                var_ln = jnp.mean(temp, axis=1, keepdims=True) - mean_ln * mean_ln
                if using_bn:
                    if training:
                        mean_bn = jnp.mean(mean_in, axis=0, keepdims=True)    # (1, C, 1)
                        var_bn = jnp.mean(temp, axis=0, keepdims=True) - mean_bn * mean_bn
                        # fused running-stat update (was post-call XLA glue + HBM round trip)
                        if using_moving_average:
                            new_rmean_ref[...] = (momentum * rmean_ref[...]
                                                  + (1.0 - momentum) * mean_bn)
                            new_rvar_ref[...] = (momentum * rvar_ref[...]
                                                 + (1.0 - momentum) * var_bn)
                        else:
                            new_rmean_ref[...] = rmean_ref[...] + mean_bn
                            new_rvar_ref[...] = (rvar_ref[...]
                                                 + mean_bn * mean_bn + var_bn)
                    else:
                        mean_bn = rmean_ref[...]
                        var_bn = rvar_ref[...]
                    mean = (mw_ref[0] * mean_in + mw_ref[1] * mean_ln
                            + mw_ref[2] * mean_bn)
                    var = (vw_ref[0] * var_in + vw_ref[1] * var_ln
                           + vw_ref[2] * var_bn)
                else:
                    mean = mw_ref[0] * mean_in + mw_ref[1] * mean_ln
                    var = vw_ref[0] * var_in + vw_ref[1] * var_ln
                inv_std = jax.lax.rsqrt(var + eps)               # single EUP op (free slot)
                scale = gamma_ref[...] * inv_std                 # (N, C, 1)
                shift = beta_ref[...] - mean * scale
                stat_a_ref[...] = scale                          # reuse the accumulators
                stat_b_ref[...] = shift

            xb = x_ref[0].astype(jnp.float32)                    # (C, T)
            y = xb * stat_a_ref[bi] + stat_b_ref[bi]             # lane-dense FMA
            y_ref[0] = y.astype(y_ref.dtype)                     # write back in I/O dtype

    return kernel


def _pick_spatial_tile(hw, c, io_bytes, budget_bytes):
    """Largest multiple-of-128 divisor of HW whose double-buffered x/y tiles fit the budget."""
    cpad = -(-c // 8) * 8
    per_lane = cpad * 2 * 2 * io_bytes          # x-in + y-out streams, each double-buffered
    t_cap = min(2048, max(128, budget_bytes // max(per_lane, 1)))
    best = 0
    t = 128
    while t <= min(hw, t_cap):
        if hw % t == 0:
            best = t
        t += 128
    # TODO(synk): HW < 128 or not a multiple of 128 falls back to one full-width tile per row;
    #             a masked ragged-tile variant would lift that restriction.
    return best if best else hw


# ----------------------------------------------------------------------------
# Functional wrapper (running buffers returned instead of mutated in place)
# ----------------------------------------------------------------------------
def switch_norm2d(x, params, *, eps=1e-5, momentum=0.9, training=True,
                  using_moving_average=True, using_bn=True):
    assert x.ndim == 4, f"expected 4D input (got {x.ndim}D input)"
    N, C, H, W = x.shape
    HW = H * W
    f32 = jnp.float32
    x3 = x.reshape(N, C, HW)                                  # native dtype in/out (bf16 stays bf16)
    gamma = params['weight'].astype(f32).reshape(1, C, 1)
    beta = params['bias'].astype(f32).reshape(1, C, 1)
    rmean = params['running_mean'].astype(f32).reshape(1, C, 1)
    rvar = params['running_var'].astype(f32).reshape(1, C, 1)
    # Softmax over the 2/3 switch weights: parameter-only O(3) work kept in glue; the
    # softmaxed scalars ride into the kernel through SMEM.
    mw = jax.nn.softmax(params['mean_weight'].astype(f32))
    vw = jax.nn.softmax(params['var_weight'].astype(f32))

    # ---- explicit VMEM / tile budget (fits v7x 64 MiB as well as v5e/v6e 128 MiB) ------
    cpad = -(-C // 8) * 8
    scratch_bytes = 2 * N * cpad * 128 * 4            # two (N, C, 1) f32 stat buffers (lane-padded)
    tile_budget = max(4 * 1024 * 1024, 20 * 1024 * 1024 - scratch_bytes)
    T = _pick_spatial_tile(HW, C, x3.dtype.itemsize, tile_budget)
    G = HW // T

    emit_running = using_bn and training
    kernel = _make_switch_norm_kernel(
        eps=float(eps), momentum=float(momentum), hw=HW, training=bool(training),
        using_bn=bool(using_bn), using_moving_average=bool(using_moving_average))

    small = lambda p, b, g: (0, 0, 0)
    in_specs = [
        pl.BlockSpec((1, C, T), lambda p, b, g: (b, 0, g)),   # x (streamed once per phase)
        pl.BlockSpec((1, C, 1), small),                       # gamma (resident)
        pl.BlockSpec((1, C, 1), small),                       # beta
    ]
    inputs = [x3, gamma, beta]
    if using_bn:
        in_specs += [pl.BlockSpec((1, C, 1), small),          # running_mean
                     pl.BlockSpec((1, C, 1), small)]          # running_var
        inputs += [rmean, rvar]
    in_specs += [pl.BlockSpec(memory_space=pltpu.MemorySpace.SMEM),   # softmaxed mean weights
                 pl.BlockSpec(memory_space=pltpu.MemorySpace.SMEM)]   # softmaxed var weights
    inputs += [mw, vw]

    # y's block index is pinned to (0,0,0) during phase 0 so the (unwritten) output buffer is
    # never flushed to HBM; phase 1 writes every (b, g) block exactly once.
    out_specs = [pl.BlockSpec((1, C, T), lambda p, b, g: (b * p, 0, g * p))]
    out_shape = [jax.ShapeDtypeStruct((N, C, HW), x3.dtype)]
    if emit_running:
        out_specs += [pl.BlockSpec((1, C, 1), small), pl.BlockSpec((1, C, 1), small)]
        out_shape += [jax.ShapeDtypeStruct((1, C, 1), f32),
                      jax.ShapeDtypeStruct((1, C, 1), f32)]

    # TODO(synk): a v7x megacore could use both TensorCores with a 2-call (stats / apply) split
    #             or CMEM-shared stats; the fused single call keeps the grid sequential
    #             ("arbitrary") because phase 1 depends on all of phase 0.
    results = pl.pallas_call(
        kernel,
        grid=(2, N, G),
        in_specs=in_specs,
        out_specs=tuple(out_specs),
        out_shape=tuple(out_shape),
        scratch_shapes=[pltpu.VMEM((N, C, 1), f32),    # sum   -> scale (reused)
                        pltpu.VMEM((N, C, 1), f32)],   # sumsq -> shift (reused)
        compiler_params=pltpu.CompilerParams(
            dimension_semantics=("arbitrary", "arbitrary", "arbitrary"),
            vmem_limit_bytes=32 * 1024 * 1024,
        ),
    )(*inputs)

    y = results[0].reshape(N, C, H, W)
    if emit_running:
        new_rmean, new_rvar = results[1], results[2]
    else:
        new_rmean, new_rvar = rmean, rvar
    return y, new_rmean, new_rvar


# ----------------------------------------------------------------------------
# Pure-JAX reference (mirrors the PyTorch forward) for self-checking
# ----------------------------------------------------------------------------
def switch_norm2d_reference(x, params, *, eps=1e-5, momentum=0.9, training=True,
                            using_moving_average=True, using_bn=True):
    N, C, H, W = x.shape
    x3 = x.astype(jnp.float32).reshape(N, C, H * W)
    mean_in = jnp.mean(x3, axis=-1, keepdims=True)
    var_in = jnp.var(x3, axis=-1, keepdims=True, ddof=1)           # torch .var() unbiased
    mean_ln = jnp.mean(mean_in, axis=1, keepdims=True)
    temp = var_in + mean_in ** 2
    var_ln = jnp.mean(temp, axis=1, keepdims=True) - mean_ln ** 2
    mw = jax.nn.softmax(params['mean_weight'].astype(jnp.float32))
    vw = jax.nn.softmax(params['var_weight'].astype(jnp.float32))
    rmean = params['running_mean'].astype(jnp.float32).reshape(1, C, 1)
    rvar = params['running_var'].astype(jnp.float32).reshape(1, C, 1)
    new_rmean, new_rvar = rmean, rvar
    if using_bn:
        if training:
            mean_bn = jnp.mean(mean_in, axis=0, keepdims=True)
            var_bn = jnp.mean(temp, axis=0, keepdims=True) - mean_bn ** 2
            if using_moving_average:
                new_rmean = momentum * rmean + (1.0 - momentum) * mean_bn
                new_rvar = momentum * rvar + (1.0 - momentum) * var_bn
            else:
                new_rmean = rmean + mean_bn
                new_rvar = rvar + mean_bn ** 2 + var_bn
        else:
            mean_bn, var_bn = rmean, rvar
        mean = mw[0] * mean_in + mw[1] * mean_ln + mw[2] * mean_bn
        var = vw[0] * var_in + vw[1] * var_ln + vw[2] * var_bn
    else:
        mean = mw[0] * mean_in + mw[1] * mean_ln
        var = vw[0] * var_in + vw[1] * var_ln
    y = (x3 - mean) / jnp.sqrt(var + eps)
    y = y.reshape(N, C, H, W)
    y = y * params['weight'].reshape(1, C, 1, 1) + params['bias'].reshape(1, C, 1, 1)
    return y, new_rmean, new_rvar


if __name__ == "__main__":
    key = jax.random.PRNGKey(0)
    kx, kg, kb, kmw, kvw, krm, krv = jax.random.split(key, 7)
    N, C, H, W = 2, 4, 16, 16
    x = jax.random.normal(kx, (N, C, H, W), jnp.float32)
    params = {
        'weight': 1.0 + 0.1 * jax.random.normal(kg, (1, C, 1, 1), jnp.float32),
        'bias': 0.1 * jax.random.normal(kb, (1, C, 1, 1), jnp.float32),
        'mean_weight': jnp.ones((3,), jnp.float32)
                       + 0.1 * jax.random.normal(kmw, (3,), jnp.float32),
        'var_weight': jnp.ones((3,), jnp.float32)
                      + 0.1 * jax.random.normal(kvw, (3,), jnp.float32),
        'running_mean': 0.05 * jax.random.normal(krm, (1, C, 1), jnp.float32),
        'running_var': 0.5 + 0.1 * jnp.abs(jax.random.normal(krv, (1, C, 1), jnp.float32)),
    }

    # ---- training mode (default nn.Module state): batch BN stats + fused running update ----
    fwd_train = jax.jit(lambda xx, pp: switch_norm2d(xx, pp, training=True))
    y, new_rm, new_rv = fwd_train(x, params)
    jax.block_until_ready((y, new_rm, new_rv))
    assert y.shape == (N, C, H, W) and y.dtype == x.dtype
    y_ref, rm_ref, rv_ref = switch_norm2d_reference(x, params, training=True)
    err = float(jnp.max(jnp.abs(y - y_ref)))
    assert err < 1e-3, f"training-mode output mismatch: max abs err {err}"
    assert float(jnp.max(jnp.abs(new_rm - rm_ref))) < 1e-3, "running_mean update mismatch"
    assert float(jnp.max(jnp.abs(new_rv - rv_ref))) < 1e-3, "running_var update mismatch"

    # ---- eval mode: running buffers feed the BN branch --------------------------------------
    fwd_eval = jax.jit(lambda xx, pp: switch_norm2d(xx, pp, training=False))
    y_e, _, _ = fwd_eval(x, params)
    jax.block_until_ready(y_e)
    y_e_ref, _, _ = switch_norm2d_reference(x, params, training=False)
    err_e = float(jnp.max(jnp.abs(y_e - y_e_ref)))
    assert err_e < 1e-3, f"eval-mode output mismatch: max abs err {err_e}"

    # ---- bf16 activation: I/O stays bf16 (half the HBM traffic), math in f32 ----------------
    x_bf = x.astype(jnp.bfloat16)
    y_bf, _, _ = jax.jit(lambda xx, pp: switch_norm2d(xx, pp, training=True))(x_bf, params)
    jax.block_until_ready(y_bf)
    assert y_bf.dtype == jnp.bfloat16
    y_bf_ref, _, _ = switch_norm2d_reference(x_bf, params, training=True)
    err_bf = float(jnp.max(jnp.abs(y_bf.astype(jnp.float32) - y_bf_ref)))
    assert err_bf < 5e-2, f"bf16 output mismatch: max abs err {err_bf}"

    # ---- using_bn=False (2-way switch, mode-specialized kernel) -----------------------------
    params_nobn = dict(params,
                       mean_weight=params['mean_weight'][:2],
                       var_weight=params['var_weight'][:2])
    y_nb, _, _ = jax.jit(
        lambda xx, pp: switch_norm2d(xx, pp, training=True, using_bn=False))(x, params_nobn)
    jax.block_until_ready(y_nb)
    y_nb_ref, _, _ = switch_norm2d_reference(x, params_nobn, training=True, using_bn=False)
    err_nb = float(jnp.max(jnp.abs(y_nb - y_nb_ref)))
    assert err_nb < 1e-3, f"using_bn=False output mismatch: max abs err {err_nb}"

    print("KERNEL_OK")
</pallas_src>

<mosaic_0001>
module attributes {stable_mosaic.version = 11 : i64} {
  func.func @kernel(%arg0: i32, %arg1: i32, %arg2: i32, %arg3: memref<1x4x256xf32, #tpu.memory_space<vmem>>, %arg4: memref<1x4x1xf32, #tpu.memory_space<vmem>>, %arg5: memref<1x4x1xf32, #tpu.memory_space<vmem>>, %arg6: memref<1x4x1xf32, #tpu.memory_space<vmem>>, %arg7: memref<1x4x1xf32, #tpu.memory_space<vmem>>, %arg8: memref<3xf32, #tpu.memory_space<smem>>, %arg9: memref<3xf32, #tpu.memory_space<smem>>, %arg10: memref<1x4x256xf32, #tpu.memory_space<vmem>>, %arg11: memref<1x4x1xf32, #tpu.memory_space<vmem>>, %arg12: memref<1x4x1xf32, #tpu.memory_space<vmem>>, %arg13: memref<2x4x1xf32, #tpu.memory_space<vmem>>, %arg14: memref<2x4x1xf32, #tpu.memory_space<vmem>>) attributes {dimension_semantics = [#tpu.dimension_semantics<arbitrary>, #tpu.dimension_semantics<arbitrary>, #tpu.dimension_semantics<arbitrary>], iteration_bounds = array<i64: 2, 2, 1>, scalar_prefetch = 0 : i64, scratch_operands = 2 : i64, tpu.core_type = #tpu.core_type<tc>, window_params = [{transform_indices = @transform_0, window_bounds = array<i64: 1, 4, 256>}, {pipeline_mode = #tpu.pipeline_mode<synchronous>, transform_indices = @transform_1, window_bounds = array<i64: 1, 4, 1>}, {pipeline_mode = #tpu.pipeline_mode<synchronous>, transform_indices = @transform_2, window_bounds = array<i64: 1, 4, 1>}, {pipeline_mode = #tpu.pipeline_mode<synchronous>, transform_indices = @transform_3, window_bounds = array<i64: 1, 4, 1>}, {pipeline_mode = #tpu.pipeline_mode<synchronous>, transform_indices = @transform_4, window_bounds = array<i64: 1, 4, 1>}, {transform_indices = @transform_5, window_bounds = array<i64: 3>}, {transform_indices = @transform_6, window_bounds = array<i64: 3>}, {transform_indices = @transform_7, window_bounds = array<i64: 1, 4, 256>}, {pipeline_mode = #tpu.pipeline_mode<synchronous>, transform_indices = @transform_8, window_bounds = array<i64: 1, 4, 1>}, {pipeline_mode = #tpu.pipeline_mode<synchronous>, transform_indices = @transform_9, window_bounds = array<i64: 1, 4, 1>}]} {
    %c0_i32 = arith.constant 0 : i32
    %0 = arith.cmpi eq, %arg0, %c0_i32 : i32
    %1 = arith.extui %0 : i1 to i32
    %c0_i32_0 = arith.constant 0 : i32
    %2 = arith.cmpi ne, %1, %c0_i32_0 : i32
    scf.if %2 {
      %c0 = arith.constant 0 : index
      %c0_2 = arith.constant 0 : index
      %c0_3 = arith.constant 0 : index
      %6 = vector.load %arg3[%c0, %c0_2, %c0_3] : memref<1x4x256xf32, #tpu.memory_space<vmem>>, vector<1x4x256xf32>
      %7 = vector.shape_cast %6 : vector<1x4x256xf32> to vector<4x256xf32>
      %cst = arith.constant dense<0.000000e+00> : vector<4xf32>
      %8 = vector.multi_reduction <add>, %7, %cst [1] : vector<4x256xf32> to vector<4xf32>
      %9 = vector.shape_cast %8 : vector<4xf32> to vector<4x1xf32>
      %10 = arith.mulf %7, %7 : vector<4x256xf32>
      %cst_4 = arith.constant dense<0.000000e+00> : vector<4xf32>
      %11 = vector.multi_reduction <add>, %10, %cst_4 [1] : vector<4x256xf32> to vector<4xf32>
      %12 = vector.shape_cast %11 : vector<4xf32> to vector<4x1xf32>
      %c0_i32_5 = arith.constant 0 : i32
      %13 = arith.cmpi eq, %arg2, %c0_i32_5 : i32
      %14 = arith.extui %13 : i1 to i32
      %c0_i32_6 = arith.constant 0 : i32
      %15 = arith.cmpi ne, %14, %c0_i32_6 : i32
      scf.if %15 {
        %19 = arith.index_cast %arg1 : i32 to index
        %c0_9 = arith.constant 0 : index
        %c0_10 = arith.constant 0 : index
        %20 = vector.load %arg13[%19, %c0_9, %c0_10] : memref<2x4x1xf32, #tpu.memory_space<vmem>>, vector<1x4x1xf32>
        %21 = vector.shape_cast %20 : vector<1x4x1xf32> to vector<4x1xf32>
        %22 = vector.shape_cast %9 : vector<4x1xf32> to vector<1x4x1xf32>
        tpu.vector_store %arg13[%19, %c0_9, %c0_10], %22 {strides = array<i32>} : memref<2x4x1xf32, #tpu.memory_space<vmem>>, vector<1x4x1xf32>,
        %23 = arith.index_cast %arg1 : i32 to index
        %c0_11 = arith.constant 0 : index
        %c0_12 = arith.constant 0 : index
        %24 = vector.load %arg14[%23, %c0_11, %c0_12] : memref<2x4x1xf32, #tpu.memory_space<vmem>>, vector<1x4x1xf32>
        %25 = vector.shape_cast %24 : vector<1x4x1xf32> to vector<4x1xf32>
        %26 = vector.shape_cast %12 : vector<4x1xf32> to vector<1x4x1xf32>
        tpu.vector_store %arg14[%23, %c0_11, %c0_12], %26 {strides = array<i32>} : memref<2x4x1xf32, #tpu.memory_space<vmem>>, vector<1x4x1xf32>,
      } else {
      }
      %c0_i32_7 = arith.constant 0 : i32
      %16 = arith.cmpi sgt, %arg2, %c0_i32_7 : i32
      %17 = arith.extui %16 : i1 to i32
      %c0_i32_8 = arith.constant 0 : i32
      %18 = arith.cmpi ne, %17, %c0_i32_8 : i32
      scf.if %18 {
        %19 = arith.index_cast %arg1 : i32 to index
        %c0_9 = arith.constant 0 : index
        %c0_10 = arith.constant 0 : index
        %20 = vector.load %arg13[%19, %c0_9, %c0_10] : memref<2x4x1xf32, #tpu.memory_space<vmem>>, vector<1x4x1xf32>
        %21 = vector.shape_cast %20 : vector<1x4x1xf32> to vector<4x1xf32>
        %22 = arith.addf %21, %9 : vector<4x1xf32>
        %23 = arith.index_cast %arg1 : i32 to index
        %c0_11 = arith.constant 0 : index
        %c0_12 = arith.constant 0 : index
        %24 = vector.load %arg13[%23, %c0_11, %c0_12] : memref<2x4x1xf32, #tpu.memory_space<vmem>>, vector<1x4x1xf32>
        %25 = vector.shape_cast %24 : vector<1x4x1xf32> to vector<4x1xf32>
        %26 = vector.shape_cast %22 : vector<4x1xf32> to vector<1x4x1xf32>
        tpu.vector_store %arg13[%23, %c0_11, %c0_12], %26 {strides = array<i32>} : memref<2x4x1xf32, #tpu.memory_space<vmem>>, vector<1x4x1xf32>,
        %27 = arith.index_cast %arg1 : i32 to index
        %c0_13 = arith.constant 0 : index
        %c0_14 = arith.constant 0 : index
        %28 = vector.load %arg14[%27, %c0_13, %c0_14] : memref<2x4x1xf32, #tpu.memory_space<vmem>>, vector<1x4x1xf32>
        %29 = vector.shape_cast %28 : vector<1x4x1xf32> to vector<4x1xf32>
        %30 = arith.addf %29, %12 : vector<4x1xf32>
        %31 = arith.index_cast %arg1 : i32 to index
        %c0_15 = arith.constant 0 : index
        %c0_16 = arith.constant 0 : index
        %32 = vector.load %arg14[%31, %c0_15, %c0_16] : memref<2x4x1xf32, #tpu.memory_space<vmem>>, vector<1x4x1xf32>
        %33 = vector.shape_cast %32 : vector<1x4x1xf32> to vector<4x1xf32>
        %34 = vector.shape_cast %30 : vector<4x1xf32> to vector<1x4x1xf32>
        tpu.vector_store %arg14[%31, %c0_15, %c0_16], %34 {strides = array<i32>} : memref<2x4x1xf32, #tpu.memory_space<vmem>>, vector<1x4x1xf32>,
      } else {
      }
    } else {
    }
    %c1_i32 = arith.constant 1 : i32
    %3 = arith.cmpi eq, %arg0, %c1_i32 : i32
    %4 = arith.extui %3 : i1 to i32
    %c0_i32_1 = arith.constant 0 : i32
    %5 = arith.cmpi ne, %4, %c0_i32_1 : i32
    scf.if %5 {
      %c0_i32_2 = arith.constant 0 : i32
      %6 = arith.cmpi eq, %arg1, %c0_i32_2 : i32
      %c0_i32_3 = arith.constant 0 : i32
      %7 = arith.cmpi eq, %arg2, %c0_i32_3 : i32
      %8 = arith.andi %6, %7 : i1
      %9 = arith.extui %8 : i1 to i32
      %c0_i32_4 = arith.constant 0 : i32
      %10 = arith.cmpi ne, %9, %c0_i32_4 : i32
      scf.if %10 {
        %c0_14 = arith.constant 0 : index
        %c0_15 = arith.constant 0 : index
        %c0_16 = arith.constant 0 : index
        %26 = vector.load %arg13[%c0_14, %c0_15, %c0_16] : memref<2x4x1xf32, #tpu.memory_space<vmem>>, vector<2x4x1xf32>
        %cst = arith.constant 3.906250e-03 : f32
        %27 = vector.broadcast %cst : f32 to vector<2x4x1xf32>
        %28 = arith.mulf %26, %27 : vector<2x4x1xf32>
        %c0_17 = arith.constant 0 : index
        %c0_18 = arith.constant 0 : index
        %c0_19 = arith.constant 0 : index
        %29 = vector.load %arg14[%c0_17, %c0_18, %c0_19] : memref<2x4x1xf32, #tpu.memory_space<vmem>>, vector<2x4x1xf32>
        %cst_20 = arith.constant 3.906250e-03 : f32
        %30 = vector.broadcast %cst_20 : f32 to vector<2x4x1xf32>
        %31 = arith.mulf %29, %30 : vector<2x4x1xf32>
        %32 = arith.mulf %28, %28 : vector<2x4x1xf32>
        %33 = arith.subf %31, %32 : vector<2x4x1xf32>
        %cst_21 = arith.constant 0.000000e+00 : f32
        %34 = vector.broadcast %cst_21 : f32 to vector<2x4x1xf32>
        %35 = arith.maximumf %33, %34 : vector<2x4x1xf32>
        %cst_22 = arith.constant 1.00392163 : f32
        %36 = vector.broadcast %cst_22 : f32 to vector<2x4x1xf32>
        %37 = arith.mulf %35, %36 : vector<2x4x1xf32>
        %38 = arith.mulf %28, %28 : vector<2x4x1xf32>
        %39 = arith.addf %37, %38 : vector<2x4x1xf32>
        %cst_23 = arith.constant dense<0.000000e+00> : vector<2x1xf32>
        %40 = vector.multi_reduction <add>, %28, %cst_23 [1] : vector<2x4x1xf32> to vector<2x1xf32>
        %41 = vector.shape_cast %40 : vector<2x1xf32> to vector<2x1x1xf32>
        %cst_24 = arith.constant 4.000000e+00 : f32
        %42 = vector.broadcast %cst_24 : f32 to vector<2x1x1xf32>
        %43 = arith.divf %41, %42 : vector<2x1x1xf32>
        %cst_25 = arith.constant dense<0.000000e+00> : vector<2x1xf32>
        %44 = vector.multi_reduction <add>, %39, %cst_25 [1] : vector<2x4x1xf32> to vector<2x1xf32>
        %45 = vector.shape_cast %44 : vector<2x1xf32> to vector<2x1x1xf32>
        %cst_26 = arith.constant 4.000000e+00 : f32
        %46 = vector.broadcast %cst_26 : f32 to vector<2x1x1xf32>
        %47 = arith.divf %45, %46 : vector<2x1x1xf32>
        %48 = arith.mulf %43, %43 : vector<2x1x1xf32>
        %49 = arith.subf %47, %48 : vector<2x1x1xf32>
        %cst_27 = arith.constant dense<0.000000e+00> : vector<4x1xf32>
        %50 = vector.multi_reduction <add>, %28, %cst_27 [0] : vector<2x4x1xf32> to vector<4x1xf32>
        %51 = vector.shape_cast %50 : vector<4x1xf32> to vector<1x4x1xf32>
        %cst_28 = arith.constant 2.000000e+00 : f32
        %52 = vector.broadcast %cst_28 : f32 to vector<1x4x1xf32>
        %53 = arith.divf %51, %52 : vector<1x4x1xf32>
        %cst_29 = arith.constant dense<0.000000e+00> : vector<4x1xf32>
        %54 = vector.multi_reduction <add>, %39, %cst_29 [0] : vector<2x4x1xf32> to vector<4x1xf32>
        %55 = vector.shape_cast %54 : vector<4x1xf32> to vector<1x4x1xf32>
        %cst_30 = arith.constant 2.000000e+00 : f32
        %56 = vector.broadcast %cst_30 : f32 to vector<1x4x1xf32>
        %57 = arith.divf %55, %56 : vector<1x4x1xf32>
        %58 = arith.mulf %53, %53 : vector<1x4x1xf32>
        %59 = arith.subf %57, %58 : vector<1x4x1xf32>
        %c0_31 = arith.constant 0 : index
        %c0_32 = arith.constant 0 : index
        %c0_33 = arith.constant 0 : index
        %60 = vector.load %arg6[%c0_31, %c0_32, %c0_33] : memref<1x4x1xf32, #tpu.memory_space<vmem>>, vector<1x4x1xf32>
        %cst_34 = arith.constant 0.899999976 : f32
        %61 = vector.broadcast %cst_34 : f32 to vector<1x4x1xf32>
        %62 = arith.mulf %61, %60 : vector<1x4x1xf32>
        %cst_35 = arith.constant 1.000000e-01 : f32
        %63 = vector.broadcast %cst_35 : f32 to vector<1x4x1xf32>
        %64 = arith.mulf %63, %53 : vector<1x4x1xf32>
        %65 = arith.addf %62, %64 : vector<1x4x1xf32>
        %c0_36 = arith.constant 0 : index
        %c0_37 = arith.constant 0 : index
        %c0_38 = arith.constant 0 : index
        %66 = vector.load %arg11[%c0_36, %c0_37, %c0_38] : memref<1x4x1xf32, #tpu.memory_space<vmem>>, vector<1x4x1xf32>
        tpu.vector_store %arg11[%c0_36, %c0_37, %c0_38], %65 {strides = array<i32>} : memref<1x4x1xf32, #tpu.memory_space<vmem>>, vector<1x4x1xf32>,
        %c0_39 = arith.constant 0 : index
        %c0_40 = arith.constant 0 : index
        %c0_41 = arith.constant 0 : index
        %67 = vector.load %arg7[%c0_39, %c0_40, %c0_41] : memref<1x4x1xf32, #tpu.memory_space<vmem>>, vector<1x4x1xf32>
        %cst_42 = arith.constant 0.899999976 : f32
        %68 = vector.broadcast %cst_42 : f32 to vector<1x4x1xf32>
        %69 = arith.mulf %68, %67 : vector<1x4x1xf32>
        %cst_43 = arith.constant 1.000000e-01 : f32
        %70 = vector.broadcast %cst_43 : f32 to vector<1x4x1xf32>
        %71 = arith.mulf %70, %59 : vector<1x4x1xf32>
        %72 = arith.addf %69, %71 : vector<1x4x1xf32>
        %c0_44 = arith.constant 0 : index
        %c0_45 = arith.constant 0 : index
        %c0_46 = arith.constant 0 : index
        %73 = vector.load %arg12[%c0_44, %c0_45, %c0_46] : memref<1x4x1xf32, #tpu.memory_space<vmem>>, vector<1x4x1xf32>
        tpu.vector_store %arg12[%c0_44, %c0_45, %c0_46], %72 {strides = array<i32>} : memref<1x4x1xf32, #tpu.memory_space<vmem>>, vector<1x4x1xf32>,
        %c0_47 = arith.constant 0 : index
        %74 = memref.load %arg8[%c0_47] : memref<3xf32, #tpu.memory_space<smem>>
        %75 = vector.broadcast %74 : f32 to vector<2x4x1xf32>
        %76 = arith.mulf %75, %28 : vector<2x4x1xf32>
        %c1 = arith.constant 1 : index
        %77 = memref.load %arg8[%c1] : memref<3xf32, #tpu.memory_space<smem>>
        %78 = vector.broadcast %77 : f32 to vector<2x1x1xf32>
        %79 = arith.mulf %78, %43 : vector<2x1x1xf32>
        %80 = vector.broadcast %79 : vector<2x1x1xf32> to vector<2x4x1xf32>
        %81 = arith.addf %76, %80 : vector<2x4x1xf32>
        %c2 = arith.constant 2 : index
        %82 = memref.load %arg8[%c2] : memref<3xf32, #tpu.memory_space<smem>>
        %83 = vector.broadcast %82 : f32 to vector<1x4x1xf32>
        %84 = arith.mulf %83, %53 : vector<1x4x1xf32>
        %85 = vector.broadcast %84 : vector<1x4x1xf32> to vector<2x4x1xf32>
        %86 = arith.addf %81, %85 : vector<2x4x1xf32>
        %c0_48 = arith.constant 0 : index
        %87 = memref.load %arg9[%c0_48] : memref<3xf32, #tpu.memory_space<smem>>
        %88 = vector.broadcast %87 : f32 to vector<2x4x1xf32>
        %89 = arith.mulf %88, %37 : vector<2x4x1xf32>
        %c1_49 = arith.constant 1 : index
        %90 = memref.load %arg9[%c1_49] : memref<3xf32, #tpu.memory_space<smem>>
        %91 = vector.broadcast %90 : f32 to vector<2x1x1xf32>
        %92 = arith.mulf %91, %49 : vector<2x1x1xf32>
        %93 = vector.broadcast %92 : vector<2x1x1xf32> to vector<2x4x1xf32>
        %94 = arith.addf %89, %93 : vector<2x4x1xf32>
        %c2_50 = arith.constant 2 : index
        %95 = memref.load %arg9[%c2_50] : memref<3xf32, #tpu.memory_space<smem>>
        %96 = vector.broadcast %95 : f32 to vector<1x4x1xf32>
        %97 = arith.mulf %96, %59 : vector<1x4x1xf32>
        %98 = vector.broadcast %97 : vector<1x4x1xf32> to vector<2x4x1xf32>
        %99 = arith.addf %94, %98 : vector<2x4x1xf32>
        %cst_51 = arith.constant 9.99999974E-6 : f32
        %100 = vector.broadcast %cst_51 : f32 to vector<2x4x1xf32>
        %101 = arith.addf %99, %100 : vector<2x4x1xf32>
        %102 = math.rsqrt %101 : vector<2x4x1xf32>
        %c0_52 = arith.constant 0 : index
        %c0_53 = arith.constant 0 : index
        %c0_54 = arith.constant 0 : index
        %103 = vector.load %arg4[%c0_52, %c0_53, %c0_54] : memref<1x4x1xf32, #tpu.memory_space<vmem>>, vector<1x4x1xf32>
        %104 = vector.broadcast %103 : vector<1x4x1xf32> to vector<2x4x1xf32>
        %105 = arith.mulf %104, %102 : vector<2x4x1xf32>
        %c0_55 = arith.constant 0 : index
        %c0_56 = arith.constant 0 : index
        %c0_57 = arith.constant 0 : index
        %106 = vector.load %arg5[%c0_55, %c0_56, %c0_57] : memref<1x4x1xf32, #tpu.memory_space<vmem>>, vector<1x4x1xf32>
        %107 = arith.mulf %86, %105 : vector<2x4x1xf32>
        %108 = vector.broadcast %106 : vector<1x4x1xf32> to vector<2x4x1xf32>
        %109 = arith.subf %108, %107 : vector<2x4x1xf32>
        %c0_58 = arith.constant 0 : index
        %c0_59 = arith.constant 0 : index
        %c0_60 = arith.constant 0 : index
        %110 = vector.load %arg13[%c0_58, %c0_59, %c0_60] : memref<2x4x1xf32, #tpu.memory_space<vmem>>, vector<2x4x1xf32>
        tpu.vector_store %arg13[%c0_58, %c0_59, %c0_60], %105 {strides = array<i32>} : memref<2x4x1xf32, #tpu.memory_space<vmem>>, vector<2x4x1xf32>,
        %c0_61 = arith.constant 0 : index
        %c0_62 = arith.constant 0 : index
        %c0_63 = arith.constant 0 : index
        %111 = vector.load %arg14[%c0_61, %c0_62, %c0_63] : memref<2x4x1xf32, #tpu.memory_space<vmem>>, vector<2x4x1xf32>
        tpu.vector_store %arg14[%c0_61, %c0_62, %c0_63], %109 {strides = array<i32>} : memref<2x4x1xf32, #tpu.memory_space<vmem>>, vector<2x4x1xf32>,
      } else {
      }
      %c0 = arith.constant 0 : index
      %c0_5 = arith.constant 0 : index
      %c0_6 = arith.constant 0 : index
      %11 = vector.load %arg3[%c0, %c0_5, %c0_6] : memref<1x4x256xf32, #tpu.memory_space<vmem>>, vector<1x4x256xf32>
      %12 = vector.shape_cast %11 : vector<1x4x256xf32> to vector<4x256xf32>
      %13 = arith.index_cast %arg1 : i32 to index
      %c0_7 = arith.constant 0 : index
      %c0_8 = arith.constant 0 : index
      %14 = vector.load %arg13[%13, %c0_7, %c0_8] : memref<2x4x1xf32, #tpu.memory_space<vmem>>, vector<1x4x1xf32>
      %15 = vector.shape_cast %14 : vector<1x4x1xf32> to vector<4x1xf32>
      %16 = vector.broadcast %15 : vector<4x1xf32> to vector<4x256xf32>
      %17 = arith.mulf %12, %16 : vector<4x256xf32>
      %18 = arith.index_cast %arg1 : i32 to index
      %c0_9 = arith.constant 0 : index
      %c0_10 = arith.constant 0 : index
      %19 = vector.load %arg14[%18, %c0_9, %c0_10] : memref<2x4x1xf32, #tpu.memory_space<vmem>>, vector<1x4x1xf32>
      %20 = vector.shape_cast %19 : vector<1x4x1xf32> to vector<4x1xf32>
      %21 = vector.broadcast %20 : vector<4x1xf32> to vector<4x256xf32>
      %22 = arith.addf %17, %21 : vector<4x256xf32>
      %c0_11 = arith.constant 0 : index
      %c0_12 = arith.constant 0 : index
      %c0_13 = arith.constant 0 : index
      %23 = vector.load %arg10[%c0_11, %c0_12, %c0_13] : memref<1x4x256xf32, #tpu.memory_space<vmem>>, vector<1x4x256xf32>
      %24 = vector.shape_cast %23 : vector<1x4x256xf32> to vector<4x256xf32>
      %25 = vector.shape_cast %22 : vector<4x256xf32> to vector<1x4x256xf32>
      tpu.vector_store %arg10[%c0_11, %c0_12, %c0_13], %25 {strides = array<i32>} : memref<1x4x256xf32, #tpu.memory_space<vmem>>, vector<1x4x256xf32>,
    } else {
    }
    return
  }
  func.func @transform_0(%arg0: i32, %arg1: i32, %arg2: i32) -> (i32, i32, i32) {
    %c0_i32 = arith.constant 0 : i32
    %c0_i32_0 = arith.constant 0 : i32
    return %arg1, %c0_i32, %arg2 : i32, i32, i32
  }
  func.func @transform_1(%arg0: i32, %arg1: i32, %arg2: i32) -> (i32, i32, i32) {
    %c0_i32 = arith.constant 0 : i32
    %c0_i32_0 = arith.constant 0 : i32
    %c0_i32_1 = arith.constant 0 : i32
    %c0_i32_2 = arith.constant 0 : i32
    return %c0_i32, %c0_i32_0, %c0_i32_1 : i32, i32, i32
  }
  func.func @transform_2(%arg0: i32, %arg1: i32, %arg2: i32) -> (i32, i32, i32) {
    %c0_i32 = arith.constant 0 : i32
    %c0_i32_0 = arith.constant 0 : i32
    %c0_i32_1 = arith.constant 0 : i32
    %c0_i32_2 = arith.constant 0 : i32
    return %c0_i32, %c0_i32_0, %c0_i32_1 : i32, i32, i32
  }
  func.func @transform_3(%arg0: i32, %arg1: i32, %arg2: i32) -> (i32, i32, i32) {
    %c0_i32 = arith.constant 0 : i32
    %c0_i32_0 = arith.constant 0 : i32
    %c0_i32_1 = arith.constant 0 : i32
    %c0_i32_2 = arith.constant 0 : i32
    return %c0_i32, %c0_i32_0, %c0_i32_1 : i32, i32, i32
  }
  func.func @transform_4(%arg0: i32, %arg1: i32, %arg2: i32) -> (i32, i32, i32) {
    %c0_i32 = arith.constant 0 : i32
    %c0_i32_0 = arith.constant 0 : i32
    %c0_i32_1 = arith.constant 0 : i32
    %c0_i32_2 = arith.constant 0 : i32
    return %c0_i32, %c0_i32_0, %c0_i32_1 : i32, i32, i32
  }
  func.func @transform_5(%arg0: i32, %arg1: i32, %arg2: i32) -> i32 {
    %c0_i32 = arith.constant 0 : i32
    %c0_i32_0 = arith.constant 0 : i32
    return %c0_i32 : i32
  }
  func.func @transform_6(%arg0: i32, %arg1: i32, %arg2: i32) -> i32 {
    %c0_i32 = arith.constant 0 : i32
    %c0_i32_0 = arith.constant 0 : i32
    return %c0_i32 : i32
  }
  func.func @transform_7(%arg0: i32, %arg1: i32, %arg2: i32) -> (i32, i32, i32) {
    %0 = arith.muli %arg1, %arg0 : i32
    %1 = arith.muli %arg2, %arg0 : i32
    %c0_i32 = arith.constant 0 : i32
    %c0_i32_0 = arith.constant 0 : i32
    return %0, %c0_i32, %1 : i32, i32, i32
  }
  func.func @transform_8(%arg0: i32, %arg1: i32, %arg2: i32) -> (i32, i32, i32) {
    %c0_i32 = arith.constant 0 : i32
    %c0_i32_0 = arith.constant 0 : i32
    %c0_i32_1 = arith.constant 0 : i32
    %c0_i32_2 = arith.constant 0 : i32
    return %c0_i32, %c0_i32_0, %c0_i32_1 : i32, i32, i32
  }
  func.func @transform_9(%arg0: i32, %arg1: i32, %arg2: i32) -> (i32, i32, i32) {
    %c0_i32 = arith.constant 0 : i32
    %c0_i32_0 = arith.constant 0 : i32
    %c0_i32_1 = arith.constant 0 : i32
    %c0_i32_2 = arith.constant 0 : i32
    return %c0_i32, %c0_i32_0, %c0_i32_1 : i32, i32, i32
  }
}

</mosaic_0001>

<bundles_post_ra>
// kernel: _lambda_.1
= control target key start
LH: loop header
LB: loop body
LE: loop exit
PB: predicated region body
PF: predicated region fallthrough
CT: control target
= control target key end

     0   :  { %15 = vsyncpa [#allocation5], 0  ;;  %s1150_s0 = inlined_call_operand.vmem [shape: f32[2,4,256], index: 0, kind: input, shape index: {}]   ;;  %s1151_s1 = inlined_call_operand.vmem [shape: f32[1,4,1], index: 1, kind: input, shape index: {}]   ;;  %s1152_s2 = inlined_call_operand.vmem [shape: f32[1,4,1], index: 2, kind: input, shape index: {}]   ;;  %s1153_s3 = inlined_call_operand.vmem [shape: f32[1,4,1], index: 3, kind: input, shape index: {}]   ;;  %s1154_s4 = inlined_call_operand.vmem [shape: f32[1,4,1], index: 4, kind: input, shape index: {}]   ;;  %s1155_s5 = inlined_call_operand.vmem [shape: f32[3], index: 5, kind: input, shape index: {}]   ;;  %s1156_s6 = inlined_call_operand.vmem [shape: f32[3], index: 6, kind: input, shape index: {}]   ;;  %s1157_s7 = inlined_call_operand.vmem [shape: f32[2,4,256], index: 7, kind: output, shape index: {0}]   ;;  %s1158_s8 = inlined_call_operand.vmem [shape: f32[1,4,1], index: 8, kind: output, shape index: {1}]   ;;  %s1159_s9 = inlined_call_operand.vmem [shape: f32[1,4,1], index: 9, kind: output, shape index: {2}]  }
   0x1   :  { %16 = vsyncpa [#allocation7], 0  ;;  %s994_s30 = smov 0   ;;  %s996_s10 = smov 0  }
   0x2   :  { %s998_s11 = smov 0   ;;  %s1000_s12 = smov 0  }
   0x3   :  { %s1002_s13 = smov 0  }
   0x4 LB: > { %s765_s14 = sadd.s32 4294967295, %s938_s13   ;;  %s37_s15 = sadd.s32 1, %s930_s11  ;;  %s938_s13 = sphi %s1002_s13, %s22_s13   ;;  %s934_s12 = sphi %s1000_s12, %s1171_s12   ;;  %s930_s11 = sphi %s998_s11, %s1170_s11   ;;  %s926_s10 = sphi %s996_s10, %s1169_s10   ;;  %s922_s30 = sphi %s994_s30, %s1168_s30  }
   0x5   : > { %p39_p0 = scmp.ge.s32.totalorder %s37_s15, 2  ;;  %s41_s16 = sadd.s32 1, %s934_s12 }
   0x6   : > { %p767_p1 = scmp.ge.s32.totalorder %s938_s13, 1  ;;  %p274_p2 = scmp.lt.s32.totalorder %s938_s13, 5 }
   0x7   : > { %s1173_s15 = smov (%p39_p0, %s37_s15), 0  ;;  %s1175_s16 = smov (!%p39_p0, %s41_s16), %s934_s12 }
   0x8   : > { %p1027_p3 = pnand %p767_p1, %p274_p2  ;;  %p43_p4 = scmp.ge.s32.totalorder %s1175_s16, 2 }
   0x9   : > { %p1031_p5 = scmp.eq.s32.totalorder %s765_s14, 0  ;;  %s299_s21 = sshll.u32 %s1155_s5, 4  ;;  %s300_s21 = int_to_ptr.vmem [resolvable:$true] %s299_s21 }
   0xa   : > { %s1163_s17 = scalar_select %p1027_p3, 1, 0 }
   0xb   : > { %s1164_s18 = scalar_select %p1031_p5, 1, 0 }
   0xc   : > { %p801_p6 = pneg %p1027_p3  ;;  %s1177_s16 = smov (%p43_p4, %s1175_s16), 0 }
   0xd   : > { %s310_s25 = sshll.u32 %s1156_s6, 4  ;;  %s862_s26 = scalar_lea.vmem %s300_s21, 16  ;;  %s311_s25 = int_to_ptr.vmem [resolvable:$true] %s310_s25 }
   0xe   : > { %p1044_p7 = pnand %p1031_p5, %p801_p6  ;;  %p863_p8 = scmp.ne.s32.totalorder %s300_s21, %s862_s26 }
   0xf   : > { %p870_p12 = scmp.lt.s32.totalorder %s300_s21, %s300_s21  ;;  %p871_p13 = scmp.lt.s32.totalorder %s862_s26, %s862_s26 }
  0x10   : > { %p864_p9 = pneg %p1044_p7 }
  0x11   : > { %p872_p0 = por %p871_p13, %p870_p12 }
  0x12   : > { %p865_p10 = pnand %p864_p9, %p863_p8 }
  0x14   : > { %p866_p11 = pneg %p865_p10 }
  0x16   : > { %p873_p1 = pnand %p872_p0, %p866_p11 }
  0x18   : > { %876 = shalt.err (!%p873_p1)
}
  0x19   : > { %s940_s27 = smov [#allocation4]   ;;  %s877_s28 = scalar_lea.vmem %s311_s25, 16 }
  0x1a   : > { %804 = dma.vmem_to_smem (!%p1044_p7), %s300_s21, 16, %s940_s27, [#allocation5]  }
  0x1b   : > { %p878_p2 = scmp.ne.s32.totalorder %s311_s25, %s877_s28  ;;  %p885_p5 = scmp.lt.s32.totalorder %s311_s25, %s311_s25 }
  0x1c   : > { %p886_p3 = scmp.lt.s32.totalorder %s877_s28, %s877_s28 }
  0x1d   : > { %p880_p4 = pnand %p878_p2, %p864_p9 }
  0x1e   : > { %p887_p8 = por %p886_p3, %p885_p5 }
  0x1f   : > { %p881_p6 = pneg %p880_p4 }
  0x21   : > { %p888_p10 = pnand %p887_p8, %p881_p6 }
  0x23   : > { %891 = shalt.err (!%p888_p10)
}
  0x24   : > { %s941_s29 = smov [#allocation6]   ;;  %p1166_p11 = scmp.ne.s32.totalorder %s1163_s17, 0 }
  0x25   : > { %807 = dma.vmem_to_smem (!%p1044_p7), %s311_s25, 16, %s941_s29, [#allocation7]  }
  0x26   : > { %336 = sbr.rel (%p1166_p11) target bundleno = 408 (0x198), region = 48  ;;  %p1167_p12 = scmp.ne.s32.totalorder (!%p1166_p11), %s1164_s18, 0 }
  0x2b   : > { %913 = dma.done.wait (%p1167_p12), [#allocation5], 16  }
  0x2c   : > { %915 = vsyncadd (%p1167_p12), [#allocation5], 4294967280 }
  0x2d   : > { %917 = dma.done.wait (%p1167_p12), [#allocation7], 16  }
  0x2e   : > { %919 = vsyncadd (%p1167_p12), [#allocation7], 4294967280 }
  0x2f   : > { %346 = sfence }
  0x30   : > { %p388_p3 = scmp.lt.s32.totalorder %s922_s30, 1  ;;  %s397_s14 = smul.u32 %s922_s30, %s926_s10 }
  0x31   : > { %p778_p7 = scmp.ne.s32.totalorder %s926_s10, 0 }
  0x32   : > { %s389_s17 = scalar_select %p388_p3, %s922_s30, 1 }
  0x33   : > { %p400_p5 = scmp.lt.s32.totalorder %s397_s14, 1  ;;  %414 = sbr.rel (%p778_p7) target bundleno = 205 (0xcd), region = 60 }
  0x34   : > { %s790_s19 = sshll.u32 %s389_s17, 3  ;;  %s779_s26 = sshll.u32 (!%p778_p7), %s922_s30, 2 }
  0x35   : > { %s1074_s22 = scalar_lea.vmem %s1150_s0, %s790_s19  ;;  %s1179_s14 = smov (!%p400_p5, %s397_s14), 1 }
  0x36   : > { %s791_s23 = sshll.u32 %s1179_s14, 3  ;;  %s439_s27 = scalar_lea.vmem (!%p778_p7), [#allocation2], %s779_s26 }
  0x37   : > { %s1079_s25 = scalar_lea.vmem %s1157_s7, %s791_s23  ;;  %s442_s28 = scalar_lea.vmem (!%p778_p7), [#allocation3], %s779_s26 }
  0x38   : > { %v415_v0 = vld [vmem:[%s1074_s22] sm:$0xff]  ;;  %vm419_vm0 = vcmask 1043456   ;;  %vm440_vm1 = vcmask 3072  }
  0x39   : > { %v417_v1 = vcombine.high %v415_v0, %v415_v0  ;;  %v420_v2 = vsel %vm419_vm0, %v415_v0, 0.0  ;;  %v425_v3 = vmul.f32 %v415_v0, %v415_v0 }
  0x3b   : > { %v421_v4 = vsel %vm419_vm0, %v417_v1, 0.0  ;;  %v427_v5 = vcombine.high %v425_v3, %v425_v3  ;;  %v429_v6 = vsel %vm419_vm0, %v425_v3, 0.0 }
  0x3c   : > { %v422_v7 = vadd.f32 %v421_v4, %v420_v2 }
  0x3d   : > { %v430_v8 = vsel %vm419_vm0, %v427_v5, 0.0 }
  0x3e   : > { %423 = vadd.xlane.f32.xlu0 %v422_v7  ;;  %v431_v9 = vadd.f32 %v430_v8, %v429_v6 }
  0x42   : > { %432 = vadd.xlane.f32.xlu0 %v431_v9 }
  0xc7   : > { %v424_v10 = vpop.xlane.xlu0 %423 }
  0xc8   : > { %441 = vst.msk [vmem:[%s439_s27] sm:$0xf] %vm440_vm1, %v424_v10 }
  0xcb   : > { %v433_v11 = vpop.xlane.xlu0 %432 }
  0xcc   : > { %443 = vst.msk [vmem:[%s442_s28] sm:$0xf] %vm440_vm1, %v433_v11 }
  0xcd PF: > { %p781_p9 = scmp.ne.s32.totalorder %s926_s10, 1 }
  0xce   : > { %p462_p13 = scmp.eq.s32.totalorder (!%p781_p9), %s922_s30, 0 }
  0xcf   : > { %461 = sbr.rel (%p781_p9) target bundleno = 408 (0x198), region = 72 }
  0xd4   : > { %467 = sbr.rel (!%p462_p13) target bundleno = 272 (0x110), region = 76  ;;  %v468_v12 = vld [vmem:[#allocation2] sm:$0xf] (%p462_p13)  ;;  %v469_v13 = vld [vmem:[#allocation2 + $0x4] sm:$0xf] (%p462_p13)  ;;  %vm486_vm2 = vcmask (%p462_p13), 3072  }
  0xd5   : > { %v1086_v14 = vmul.f32 (%p462_p13), 0.00390625, %v468_v12  ;;  %v1088_v15 = vmul.f32 (%p462_p13), 0.00390625, %v469_v13  ;;  %v472_v16 = vld [vmem:[#allocation3] sm:$0xf] (%p462_p13)  ;;  %v531_v17 = vld [vmem:[%s1153_s3] sm:$0xf] (%p462_p13) }
  0xd6   : > { %v473_v18 = vld [vmem:[#allocation3 + $0x4] sm:$0xf] (%p462_p13)  ;;  %v474_v19 = vmul.f32 (%p462_p13), 0.00390625, %v472_v16  ;;  %v532_v28 = vmul.f32 (%p462_p13), 0.9, %v531_v17  ;;  %s556_s21 = sld [smem:[#allocation6]] (%p462_p13) }
  0xd7   : > { %v487_v20 = vsel (%p462_p13), %vm486_vm2, %v1086_v14, 0.0  ;;  %v494_v21 = vsel (%p462_p13), %vm486_vm2, %v1088_v15, 0.0  ;;  %v475_v22 = vmul.f32 (%p462_p13), 0.00390625, %v473_v18  ;;  %v476_v23 = vmul.f32 (%p462_p13), %v1086_v14, %v1086_v14  ;;  %v536_v56 = vld [vmem:[%s1154_s4] sm:$0xf] (%p462_p13)  ;;  %s785_s23 = sld [smem:[#allocation6 + $0x1]] (%p462_p13) }
  0xd8   : > { %v488_v24 = vrot.slane (%p462_p13), %v487_v20, 4  ;;  %v495_v25 = vrot.slane (%p462_p13), %v494_v21, 4  ;;  %v524_v26 = vadd.f32 (%p462_p13), %v494_v21, %v487_v20  ;;  %v477_v27 = vmul.f32 (%p462_p13), %v1088_v15, %v1088_v15  ;;  %s786_s24 = sld [smem:[#allocation6 + $0x2]] (%p462_p13) }
  0xd9   : > { %v478_v29 = vsub.f32 %v474_v19, %v476_v23  ;;  %v537_v63 = vmul.f32 0.9, %v536_v56  ;;  %s541_s27 = sld [smem:[#allocation4]] }
  0xda   : > { %v489_v30 = vadd.f32 %v488_v24, %v487_v20  ;;  %v496_v31 = vadd.f32 %v495_v25, %v494_v21  ;;  %v1101_v32 = vmul.f32 0.5, %v524_v26  ;;  %v479_v33 = vsub.f32 %v475_v22, %v477_v27  ;;  %s783_s28 = sld [smem:[#allocation4 + $0x1]] }
  0xdb   : > { %v480_v34 = vmax.f32 %v478_v29, 0.0  ;;  %s784_s29 = sld [smem:[#allocation4 + $0x2]] }
  0xdc   : > { %v490_v35 = vrot.slane %v489_v30, 2  ;;  %v497_v36 = vrot.slane %v496_v31, 2  ;;  %v533_v37 = vmul.f32 0.1, %v1101_v32  ;;  %v481_v38 = vmax.f32 %v479_v33, 0.0 }
  0xdd   : > { %v482_v39 = vmul.f32 1.0039216, %v480_v34  ;;  %v529_v53 = vmul.f32 %v1101_v32, %v1101_v32  ;;  %v557_v12 = vstv %s556_s21  ;;  %v561_v17 = vstv %s785_s23 }
  0xde   : > { %v491_v40 = vadd.f32 %v490_v35, %v489_v30  ;;  %v498_v41 = vadd.f32 %v497_v36, %v496_v31  ;;  %v534_v42 = vadd.f32 %v533_v37, %v532_v28  ;;  %v483_v43 = vmul.f32 1.0039216, %v481_v38 }
  0xdf   : > { %v484_v44 = vadd.f32 %v482_v39, %v476_v23  ;;  %v567_v18 = vstv %s786_s24  ;;  %v558_v20 = vmul.f32 %v557_v12, %v482_v39  ;;  %v542_v33 = vstv %s541_s27 }
  0xe0   : > { %v492_v45 = vrot.slane %v491_v40, 1  ;;  %535 = vst.msk [vmem:[%s1158_s8] sm:$0xf] %vm486_vm2, %v534_v42  ;;  %v485_v46 = vadd.f32 %v483_v43, %v477_v27  ;;  %v499_v47 = vrot.slane %v498_v41, 1  ;;  %v559_v22 = vmul.f32 %v557_v12, %v483_v43  ;;  %v575_v43 = vld [vmem:[%s1151_s1] sm:$0xf] }
  0xe1   : > { %v504_v48 = vsel %vm486_vm2, %v484_v44, 0.0  ;;  %v546_v34 = vstv %s783_s28  ;;  %v543_v35 = vmul.f32 %v542_v33, %v1086_v14  ;;  %v552_v37 = vstv %s784_s29  ;;  %v578_v14 = vld [vmem:[%s1152_s2] sm:$0xf] }
  0xe2   : > { %v505_v49 = vrot.slane %v504_v48, 4  ;;  %v511_v50 = vsel %vm486_vm2, %v485_v46, 0.0  ;;  %v493_v54 = vadd.f32 %v492_v45, %v491_v40  ;;  %v500_v57 = vadd.f32 %v499_v47, %v498_v41 }
  0xe3   : > { %v512_v51 = vrot.slane %v511_v50, 4  ;;  %v527_v52 = vadd.f32 %v511_v50, %v504_v48  ;;  %v544_v38 = vmul.f32 %v542_v33, %v1088_v15  ;;  %v553_v41 = vmul.f32 %v552_v37, %v1101_v32 }
  0xe4   : > { %v506_v55 = vadd.f32 %v505_v49, %v504_v48  ;;  %v502_v0 = vmul.f32 0.25, %v493_v54  ;;  %v503_v2 = vmul.f32 0.25, %v500_v57 }
  0xe5   : > { %v513_v58 = vadd.f32 %v512_v51, %v511_v50  ;;  %v528_v59 = vmul.f32 0.5, %v527_v52 }
  0xe6   : > { %v507_v60 = vrot.slane %v506_v55, 2  ;;  %v520_v9 = vmul.f32 %v502_v0, %v502_v0  ;;  %v521_v11 = vmul.f32 %v503_v2, %v503_v2  ;;  %v547_v36 = vmul.f32 %v546_v34, %v502_v0 }
  0xe7   : > { %v514_v61 = vrot.slane %v513_v58, 2  ;;  %v530_v62 = vsub.f32 %v528_v59, %v529_v53  ;;  %v548_v39 = vmul.f32 %v546_v34, %v503_v2 }
  0xe8   : > { %v508_v1 = vadd.f32 %v507_v60, %v506_v55  ;;  %v549_v40 = vadd.f32 %v547_v36, %v543_v35 }
  0xe9   : > { %v515_v3 = vadd.f32 %v514_v61, %v513_v58  ;;  %v538_v4 = vmul.f32 0.1, %v530_v62  ;;  %v568_v24 = vmul.f32 %v567_v18, %v530_v62  ;;  %v550_v42 = vadd.f32 %v548_v39, %v544_v38 }
  0xea   : > { %v509_v5 = vrot.slane %v508_v1, 1  ;;  %v554_v44 = vadd.f32 %v553_v41, %v549_v40 }
  0xeb   : > { %v516_v6 = vrot.slane %v515_v3, 1  ;;  %v539_v7 = vadd.f32 %v538_v4, %v537_v63  ;;  %v555_v46 = vadd.f32 %v553_v41, %v550_v42 }
  0xec   : > { %v510_v8 = vadd.f32 %v509_v5, %v508_v1 }
  0xed   : > { %v517_v10 = vadd.f32 %v516_v6, %v515_v3  ;;  %540 = vst.msk [vmem:[%s1159_s9] sm:$0xf] %vm486_vm2, %v539_v7 }
  0xee   : > { %v518_v13 = vmul.f32 0.25, %v510_v8 }
  0xef   : > { %v519_v16 = vmul.f32 0.25, %v517_v10 }
  0xf0   : > { %v522_v19 = vsub.f32 %v518_v13, %v520_v9 }
  0xf1   : > { %v523_v21 = vsub.f32 %v519_v16, %v521_v11 }
  0xf2   : > { %v562_v23 = vmul.f32 %v561_v17, %v522_v19 }
  0xf3   : > { %v563_v25 = vmul.f32 %v561_v17, %v523_v21 }
  0xf4   : > { %v564_v26 = vadd.f32 %v562_v23, %v558_v20 }
  0xf5   : > { %v565_v27 = vadd.f32 %v563_v25, %v559_v22 }
  0xf6   : > { %v569_v28 = vadd.f32 %v568_v24, %v564_v26 }
  0xf7   : > { %v570_v29 = vadd.f32 %v568_v24, %v565_v27 }
  0xf8   : > { %v571_v30 = vadd.f32 1e-05, %v569_v28 }
  0xf9   : > { %v572_v31 = vadd.f32 1e-05, %v570_v29 }
  0xfa   : > { %857 = vrsqrt.f32 %v571_v30 }
  0xfb   : > { %859 = vrsqrt.f32 %v572_v31 }
 0x107   : > { %v858_v45 = vpop.eup %857 }
 0x108   : > { %v860_v47 = vpop.eup %859  ;;  %v576_v48 = vmul.f32 %v858_v45, %v575_v43 }
 0x109   : > { %v577_v49 = vmul.f32 %v860_v47, %v575_v43 }
 0x10a   : > { %583 = vst.msk [vmem:[#allocation2] sm:$0xf] %vm486_vm2, %v576_v48  ;;  %v579_v15 = vmul.f32 %v576_v48, %v554_v44 }
 0x10b   : > { %584 = vst.msk [vmem:[#allocation2 + $0x4] sm:$0xf] %vm486_vm2, %v577_v49  ;;  %v580_v32 = vmul.f32 %v577_v49, %v555_v46 }
 0x10c   : > { %v581_v50 = vsub.f32 %v578_v14, %v579_v15 }
 0x10d   : > { %v582_v51 = vsub.f32 %v578_v14, %v580_v32 }
 0x10e   : > { %585 = vst.msk [vmem:[#allocation3] sm:$0xf] %vm486_vm2, %v581_v50 }
 0x10f   : > { %586 = vst.msk [vmem:[#allocation3 + $0x4] sm:$0xf] %vm486_vm2, %v582_v51 }
 0x110 PF: > { %s787_s20 = sshll.u32 %s922_s30, 2  ;;  %v942_v52 = vmov 0   ;;  %v943_v55 = vmov 839922192   ;;  %v598_v57 = vlaneseq  ;;  %v587_v63 = vld [vmem:[%s1074_s22] sm:$0xff] }
 0x111   : > { %861 = vset.pattern.permute.xlu0 %v942_v52  ;;  %s589_s21 = scalar_lea.vmem [#allocation2], %s787_s20  ;;  %s604_s23 = scalar_lea.vmem [#allocation3], %s787_s20  ;;  %v596_v56 = vunpack.c.l.s4 %v943_v55 }
 0x112   : > { %v590_v53 = vld [vmem:[%s589_s21] sm:$0xf]  ;;  %v599_v59 = vshrl.u32 %v598_v57, 7 }
 0x113   : > { %593 = vperm.xlu0 %861, %v590_v53   ;;  %v597_v58 = vunpack.c.0.s8 %v596_v56 }
 0x115   : > { %v600_v60 = vsub.s32 %v597_v58, %v599_v59 }
 0x116   : > { %v605_v54 = vld [vmem:[%s604_s23] sm:$0xf] }
 0x117   : > { %608 = vperm.xlu0 %861, %v605_v54  }
 0x18e   : > { %v594_v61 = vpop.permute.xlu0 %593 }
 0x18f   : > { %v601_v62 = vrot.slane %v594_v61, %v600_v60 }
 0x191   : > { %v603_v1 = vmul.f32 %v601_v62, %v587_v63 }
 0x192   : > { %v609_v0 = vpop.permute.xlu0 %608 }
 0x193   : > { %v616_v2 = vrot.slane %v609_v0, %v600_v60 }
 0x195   : > { %v618_v3 = vadd.f32 %v616_v2, %v603_v1 }
 0x197   : > { %619 = vst [vmem:[%s1079_s25] sm:$0xff] %v618_v3 }
 0x198 PF: > { %s22_s13 = sadd.s32 1, %s938_s13   ;;  %s1168_s30 = smov %s930_s11 }
 0x199   : > { %p19_p0 = scmp.ge.s32.totalorder %s22_s13, 6   ;;  %s1169_s10 = smov %s934_s12 }
 0x19a   : > { %s1170_s11 = smov %s1173_s15  ;;  %s1171_s12 = smov %s1177_s16 }
 0x19b   :  { %21 = sbr.rel (!%p19_p0) target bundleno = 4 (0x4), region = 129 }
 0x1a0   :  { %668 = vsyncpa [#allocation5], 1 }
 0x1a1   :  { %670 = vsyncpa [#allocation5 + $0x1], 1 }
 0x1a2   :  { %671 = vsyncpa [#allocation7], 1 }

</bundles_post_ra>
